<compile_context>
chip_gen: v7x
topology: tpu7x:2x2x1
jax: 0.10.0
libtpu: 0.0.40
codegen_flags: <defaults>
</compile_context>

<pallas_src>
import functools
import math

import jax
import jax.numpy as jnp
from jax.experimental import pallas as pl
from jax.experimental.pallas import tpu as pltpu


# --------------------------------------------------------------------------
# Kernel 1: QKV projection
# --------------------------------------------------------------------------
def _qkv_proj_kernel(x_ref, w_ref, o_ref):
    # x_ref: (1, tn, C) bf16, w_ref: (C, 3C) bf16 (VMEM-resident, single copy),
    # o_ref: (1, tn, 3C) bf16.  f32 accumulation on the MXU.
    o_ref[0] = jnp.dot(
        x_ref[0], w_ref[...], preferred_element_type=jnp.float32
    ).astype(o_ref.dtype)


# --------------------------------------------------------------------------
# Kernel 2: flash attention (online softmax) + fused output projection
# --------------------------------------------------------------------------
def _flash_attn_proj_kernel(q_ref, k_ref, v_ref, wp_ref, bp_ref, o_ref,
                            m_sc, l_sc, acc_sc, *, num_heads):
    """Grid = (batch, q_tiles, kv_tiles); the kv axis is the inner reduction.

    q_ref:  (1, H, tq, D)  queries (scale already folded into the weight), bf16
    k_ref:  (1, H, tk, D)  keys,   bf16
    v_ref:  (1, H, tk, D)  values, bf16
    wp_ref: (H, D, C)      proj weight, VMEM-resident, bf16
    bp_ref: (1, C)         proj bias, f32
    o_ref:  (1, tq, C)     output block, written once on the last kv step
    m_sc/l_sc: (H, tq, 1)  f32 running max / running softmax denominator
    acc_sc:    (H, tq, D)  f32 running numerator (sum of p @ v)
    """
    ki = pl.program_id(2)

    @pl.when(ki == 0)
    def _init():
        m_sc[...] = jnp.full(m_sc.shape, -jnp.inf, m_sc.dtype)
        l_sc[...] = jnp.zeros(l_sc.shape, l_sc.dtype)
        acc_sc[...] = jnp.zeros(acc_sc.shape, acc_sc.dtype)

    q = q_ref[0]   # (H, tq, D)
    k = k_ref[0]   # (H, tk, D)
    v = v_ref[0]   # (H, tk, D)

    # All heads in one batched contraction: no per-head slicing / copies.
    s = jnp.einsum("hqd,hkd->hqk", q, k,
                   preferred_element_type=jnp.float32)          # (H, tq, tk) f32

    m_prev = m_sc[...]
    m_new = jnp.maximum(m_prev, jnp.max(s, axis=-1, keepdims=True))
    alpha = jnp.exp(m_prev - m_new)                              # (H, tq, 1)
    p = jnp.exp(s - m_new)                                       # (H, tq, tk)

    l_sc[...] = alpha * l_sc[...] + jnp.sum(p, axis=-1, keepdims=True)
    acc_sc[...] = alpha * acc_sc[...] + jnp.einsum(
        "hqk,hkd->hqd", p.astype(v.dtype), v,
        preferred_element_type=jnp.float32)                      # (H, tq, D)
    m_sc[...] = m_new

    @pl.when(ki == pl.num_programs(2) - 1)
    def _epilogue():
        # EUP approximate reciprocal: softmax denominator off the VPU path.
        inv_l = pl.reciprocal(l_sc[...], approx=True)            # (H, tq, 1)
        y = (acc_sc[...] * inv_l).astype(q_ref.dtype)            # (H, tq, D) bf16
        tq = y.shape[1]
        out_c = wp_ref.shape[-1]
        # Output projection contracts over (head, head_dim) directly: no head
        # merge / concatenate; the single store below is lane-dense (tq, C).
        out = jnp.zeros((tq, out_c), jnp.float32)
        for h in range(num_heads):
            out = out + jnp.dot(y[h], wp_ref[h],
                                preferred_element_type=jnp.float32)
        out = out + bp_ref[...].astype(jnp.float32)
        o_ref[0] = out.astype(o_ref.dtype)


# --------------------------------------------------------------------------
# Wrapper
# --------------------------------------------------------------------------
def _pick_tile(n, target):
    """Largest multiple of 8 that divides n and is <= target (else n itself)."""
    if n <= target:
        return n
    for t in range(target - target % 8, 7, -8):
        if n % t == 0:
            return t
    return n


def attention_forward(x, wqkv, wproj, bproj, *, num_heads,
                      compute_dtype=jnp.bfloat16,
                      q_tile=256, kv_tile=256, row_tile=256):
    """x: (B, N, C); wqkv: (3C, C) torch layout; wproj: (C, C); bproj: (C,)."""
    B, N, C = x.shape
    assert C % num_heads == 0
    H = num_heads
    D = C // H
    scale = D ** (-0.5)
    out_dtype = x.dtype

    # torch Linear computes y = x @ W^T (+ b): pre-transpose once so the kernels
    # do plain row-major matmuls.  Fold the softmax scale into the Q columns of
    # the QKV weight (weight-constant transform; removes a per-token multiply).
    wqkv_t = jnp.asarray(wqkv, jnp.float32).T                 # (C, 3C), cols=(3,H,D)
    wqkv_t = wqkv_t.at[:, :C].multiply(scale)
    wqkv_t = wqkv_t.astype(compute_dtype)
    wproj_r = jnp.asarray(wproj, jnp.float32).T.reshape(H, D, C).astype(compute_dtype)
    bproj_2d = jnp.asarray(bproj, jnp.float32).reshape(1, C)

    x_c = x.astype(compute_dtype)

    # ---- Kernel 1: QKV projection ---------------------------------------
    tn = _pick_tile(N, row_tile)
    qkv = pl.pallas_call(
        _qkv_proj_kernel,
        out_shape=jax.ShapeDtypeStruct((B, N, 3 * C), compute_dtype),
        grid_spec=pltpu.PrefetchScalarGridSpec(
            num_scalar_prefetch=0,
            grid=(B, N // tn),
            in_specs=[
                pl.BlockSpec((1, tn, C), lambda b, i: (b, i, 0)),
                # Whole weight kept VMEM-resident (not pipelined => single copy).
                pl.BlockSpec(memory_space=pltpu.MemorySpace.VMEM),
            ],
            out_specs=pl.BlockSpec((1, tn, 3 * C), lambda b, i: (b, i, 0)),
        ),
        compiler_params=pltpu.CompilerParams(
            dimension_semantics=("parallel", "parallel"),
            vmem_limit_bytes=64 * 1024 * 1024,
        ),
    )(x_c, wqkv_t)

    # Layout plumbing only (XLA): split heads -> (B, H, N, D) so the attention
    # kernel sees head-batched, lane-dense blocks with no in-kernel slicing.
    qkv = qkv.reshape(B, N, 3, H, D)
    q = jnp.transpose(qkv[:, :, 0], (0, 2, 1, 3))
    k = jnp.transpose(qkv[:, :, 1], (0, 2, 1, 3))
    v = jnp.transpose(qkv[:, :, 2], (0, 2, 1, 3))

    # ---- Kernel 2: flash attention + fused output projection -------------
    tq = _pick_tile(N, q_tile)
    tk = _pick_tile(N, kv_tile)
    kernel = functools.partial(_flash_attn_proj_kernel, num_heads=H)
    out = pl.pallas_call(
        kernel,
        out_shape=jax.ShapeDtypeStruct((B, N, C), out_dtype),
        grid_spec=pltpu.PrefetchScalarGridSpec(
            num_scalar_prefetch=0,
            grid=(B, N // tq, N // tk),
            in_specs=[
                pl.BlockSpec((1, H, tq, D), lambda b, qi, ki: (b, 0, qi, 0)),
                pl.BlockSpec((1, H, tk, D), lambda b, qi, ki: (b, 0, ki, 0)),
                pl.BlockSpec((1, H, tk, D), lambda b, qi, ki: (b, 0, ki, 0)),
                pl.BlockSpec(memory_space=pltpu.MemorySpace.VMEM),  # wproj (H,D,C)
                pl.BlockSpec(memory_space=pltpu.MemorySpace.VMEM),  # bias (1,C)
            ],
            out_specs=pl.BlockSpec((1, tq, C), lambda b, qi, ki: (b, qi, 0)),
            scratch_shapes=[
                pltpu.VMEM((H, tq, 1), jnp.float32),   # running max
                pltpu.VMEM((H, tq, 1), jnp.float32),   # running denominator
                pltpu.VMEM((H, tq, D), jnp.float32),   # running numerator
            ],
        ),
        compiler_params=pltpu.CompilerParams(
            # batch + query-tile axes parallel (shards across both v7x cores
            # even for small B); kv axis is the online-softmax reduction.
            dimension_semantics=("parallel", "parallel", "arbitrary"),
            vmem_limit_bytes=64 * 1024 * 1024,
        ),
    )(q, k, v, wproj_r, bproj_2d)
    return out


# --------------------------------------------------------------------------
# Pure-JAX reference mirroring the PyTorch forward exactly
# --------------------------------------------------------------------------
def attention_reference(x, wqkv, wproj, bproj, *, num_heads):
    B, N, C = x.shape
    D = C // num_heads
    scale = D ** (-0.5)
    qkv = jnp.einsum("bnc,oc->bno", x, wqkv)                   # Linear, no bias
    qkv = qkv.reshape(B, N, 3, num_heads, D).transpose(2, 0, 3, 1, 4)
    q, k, v = qkv[0], qkv[1], qkv[2]                           # (B, H, N, D)
    q = q * scale
    attn = jnp.einsum("bhqd,bhkd->bhqk", q, k)
    attn = jax.nn.softmax(attn, axis=-1)
    y = jnp.einsum("bhqk,bhkd->bhqd", attn, v)
    y = y.transpose(0, 2, 1, 3).reshape(B, N, C)
    return jnp.einsum("bnc,oc->bno", y, wproj) + bproj


if __name__ == "__main__":
    # Small deterministic config consistent with the module.
    B, N, C = 2, 16, 64
    num_heads = 8

    key = jax.random.PRNGKey(0)
    kx, kqkv, kproj, kb = jax.random.split(key, 4)

    x = jax.random.normal(kx, (B, N, C), dtype=jnp.float32)

    bound = 1.0 / math.sqrt(C)
    wqkv = jax.random.uniform(kqkv, (3 * C, C), jnp.float32, -bound, bound)
    wproj = jax.random.uniform(kproj, (C, C), jnp.float32, -bound, bound)
    bproj = jax.random.uniform(kb, (C,), jnp.float32, -bound, bound)

    # Use small tiles so the online-softmax kv loop and epilogue are exercised.
    out = attention_forward(x, wqkv, wproj, bproj, num_heads=num_heads,
                            q_tile=8, kv_tile=8)
    out = jax.block_until_ready(out)

    # Kernel runs its matmuls in bf16 (f32 accumulation): compare against an
    # f32 reference evaluated on the bf16-rounded inputs with bf16 tolerance.
    rnd = lambda a: a.astype(jnp.bfloat16).astype(jnp.float32)
    ref = attention_reference(rnd(x), rnd(wqkv), rnd(wproj), bproj,
                              num_heads=num_heads)

    assert out.shape == (B, N, C)
    assert jnp.allclose(out, ref, atol=3e-2, rtol=3e-2), (
        "mismatch vs pure-JAX reference: max abs err = "
        f"{float(jnp.max(jnp.abs(out - ref)))}")

    print("KERNEL_OK")
</pallas_src>

<mosaic_0001>
module attributes {stable_mosaic.version = 11 : i64} {
  func.func @_qkv_proj_kernel(%arg0: i32, %arg1: i32, %arg2: memref<1x16x64xbf16, #tpu.memory_space<vmem>>, %arg3: memref<64x192xbf16, #tpu.memory_space<vmem>>, %arg4: memref<1x16x192xbf16, #tpu.memory_space<vmem>>) attributes {dimension_semantics = [#tpu.dimension_semantics<parallel>, #tpu.dimension_semantics<parallel>], iteration_bounds = array<i64: 2, 1>, scalar_prefetch = 0 : i64, scratch_operands = 0 : i64, tpu.core_type = #tpu.core_type<tc>, window_params = [{transform_indices = @transform_0, window_bounds = array<i64: 1, 16, 64>}, {pipeline_mode = #tpu.pipeline_mode<synchronous>, transform_indices = @transform_1, window_bounds = array<i64: 64, 192>}, {transform_indices = @transform_2, window_bounds = array<i64: 1, 16, 192>}]} {
    %c0 = arith.constant 0 : index
    %c0_0 = arith.constant 0 : index
    %c0_1 = arith.constant 0 : index
    %0 = vector.load %arg2[%c0, %c0_0, %c0_1] : memref<1x16x64xbf16, #tpu.memory_space<vmem>>, vector<1x16x64xbf16>
    %1 = vector.shape_cast %0 : vector<1x16x64xbf16> to vector<16x64xbf16>
    %c0_2 = arith.constant 0 : index
    %c0_3 = arith.constant 0 : index
    %2 = vector.load %arg3[%c0_2, %c0_3] : memref<64x192xbf16, #tpu.memory_space<vmem>>, vector<64x192xbf16>
    %cst = arith.constant dense<0.000000e+00> : vector<16x192xf32>
    %3 = tpu.matmul %1, %2, %cst {dimension_numbers = #tpu.dot_dimension_numbers<[1], [0], [0], [1], [0, 0, 1, 1], [], []>} : vector<16x64xbf16>, vector<64x192xbf16>, vector<16x192xf32> -> vector<16x192xf32>
    %4 = arith.truncf %3 : vector<16x192xf32> to vector<16x192xbf16>
    %c0_4 = arith.constant 0 : index
    %c0_5 = arith.constant 0 : index
    %c0_6 = arith.constant 0 : index
    %5 = vector.load %arg4[%c0_4, %c0_5, %c0_6] : memref<1x16x192xbf16, #tpu.memory_space<vmem>>, vector<1x16x192xbf16>
    %6 = vector.shape_cast %5 : vector<1x16x192xbf16> to vector<16x192xbf16>
    %7 = vector.shape_cast %4 : vector<16x192xbf16> to vector<1x16x192xbf16>
    tpu.vector_store %arg4[%c0_4, %c0_5, %c0_6], %7 {strides = array<i32>} : memref<1x16x192xbf16, #tpu.memory_space<vmem>>, vector<1x16x192xbf16>,
    return
  }
  func.func @transform_0(%arg0: i32, %arg1: i32) -> (i32, i32, i32) {
    %c0_i32 = arith.constant 0 : i32
    %c0_i32_0 = arith.constant 0 : i32
    return %arg0, %arg1, %c0_i32 : i32, i32, i32
  }
  func.func @transform_1(%arg0: i32, %arg1: i32) -> (i32, i32) {
    %c0_i32 = arith.constant 0 : i32
    %c0_i32_0 = arith.constant 0 : i32
    %c0_i32_1 = arith.constant 0 : i32
    return %c0_i32, %c0_i32_0 : i32, i32
  }
  func.func @transform_2(%arg0: i32, %arg1: i32) -> (i32, i32, i32) {
    %c0_i32 = arith.constant 0 : i32
    %c0_i32_0 = arith.constant 0 : i32
    return %arg0, %arg1, %c0_i32 : i32, i32, i32
  }
}

</mosaic_0001>

<bundles_post_ra>
// kernel: tpu_custom_call.1
= control target key start
LH: loop header
LB: loop body
LE: loop exit
PB: predicated region body
PF: predicated region fallthrough
CT: control target
= control target key end

     0   :  { %7 = vsyncpa [#allocation3], 0  ;;  %s948_s0 = inlined_call_operand.hbm [shape: bf16[2,16,64], index: 0, kind: input, shape index: {}]   ;;  %s949_s1 = inlined_call_operand.hbm [shape: bf16[64,192], index: 1, kind: input, shape index: {}]   ;;  %s950_s2 = inlined_call_operand.hbm [shape: bf16[2,16,192], index: 2, kind: output, shape index: {}]  }
   0x1   :  { %9 = vsyncpa [#allocation3 + $0x1], 0 }
   0x2   :  { %10 = vsyncpa [#allocation6], 0 }
   0x3   :  { %11 = vsyncpa [#allocation4], 0 }
   0x4   :  { %13 = vsyncpa [#allocation4 + $0x1], 0  ;;  %s728_s9 = smov 0   ;;  %s730_s10 = smov 0  }
   0x5   :  { %s732_s11 = smov 0   ;;  %s734_s12 = smov 0  }
   0x6   :  { %s736_s13 = smov 0   ;;  %s738_s14 = smov 0  }
   0x7 LB: > { %s431_s15 = sadd.s32 4294967295, %s701_s14   ;;  %s432_s16 = sadd.s32 4294967294, %s701_s14   ;;  %s701_s14 = sphi %s738_s14, %s19_s14   ;;  %s697_s13 = sphi %s736_s13, %s974_s13   ;;  %s693_s12 = sphi %s734_s12, %s973_s12   ;;  %s689_s11 = sphi %s732_s11, %s972_s11   ;;  %s685_s10 = sphi %s730_s10, %s971_s10   ;;  %s681_s9 = sphi %s728_s9, %s970_s9  }
   0x8   : > { %p53_p0 = scmp.ne.s32.totalorder %s685_s10, %s681_s9  ;;  %p762_p1 = scmp.eq.s32.totalorder %s431_s15, 0 }
   0x9   : > { %p766_p2 = scmp.eq.s32.totalorder %s431_s15, 1  ;;  %p106_p3 = scmp.eq.s32.totalorder %s432_s16, 1 }
   0xa   : > { %s955_s17 = scalar_select %p762_p1, 1, 0 }
   0xb   : > { %s956_s18 = scalar_select %p766_p2, 1, 0 }
   0xc   : > { %p772_p4 = por %p762_p1, %p53_p0  ;;  %p433_p5 = scmp.ge.s32.totalorder %s701_s14, 1 }
   0xd   : > { %p777_p6 = por %p106_p3, %p53_p0  ;;  %p113_p7 = scmp.lt.s32.totalorder %s701_s14, 3 }
   0xe   : > { %s957_s19 = scalar_select %p772_p4, 1, 0 }
   0xf   : > { %s958_s20 = scalar_select %p777_p6, 1, 0 }
  0x10   : > { %p782_p8 = pnand %p433_p5, %p113_p7  ;;  %s703_s22 = smov [#allocation5]  }
  0x11   : > { %s125_s23 = sshll.u32 %s703_s22, 4  ;;  %s31_s25 = sadd.s32 1, %s697_s13  ;;  %s126_s23 = int_to_ptr.vmem [resolvable:$true] %s125_s23 }
  0x12   : > { %s959_s21 = scalar_select %p782_p8, 1, 0 }
  0x13   : > { %p472_p9 = pneg %p782_p8  ;;  %s557_s28 = scalar_lea.hbm %s949_s1, 1024 }
  0x14   : > { %p558_p12 = scmp.ne.s32.totalorder %s949_s1, %s557_s28  ;;  %p564_p5 = scmp.lt.u32.totalorder %s557_s28, %s949_s1 }
  0x15   : > { %p791_p11 = pnand %p472_p9, %p762_p1 }
  0x17   : > { %p559_p13 = pneg %p791_p11 }
  0x19   : > { %p560_p0 = pnand %p559_p13, %p558_p12 }
  0x1b   : > { %p561_p3 = pneg %p560_p0 }
  0x1d   : > { %p566_p7 = pnand %p564_p5, %p561_p3 }
  0x1f   : > { %569 = shalt.err (!%p566_p7)
}
  0x20   : > { %s570_s5 = scalar_lea.vmem %s126_s23, 1024  ;;  %p578_p1 = scmp.lt.s32.totalorder %s126_s23, %s126_s23 }
  0x21   : > { %p571_p9 = scmp.ne.s32.totalorder %s126_s23, %s570_s5  ;;  %p579_p4 = scmp.lt.s32.totalorder %s570_s5, %s570_s5 }
  0x23   : > { %p573_p10 = pnand %p571_p9, %p559_p13  ;;  %p580_p8 = por %p579_p4, %p578_p1 }
  0x25   : > { %p574_p6 = pneg %p573_p10 }
  0x27   : > { %p581_p2 = pnand %p580_p8, %p574_p6 }
  0x29   : > { %584 = shalt.err (!%p581_p2)
}
  0x2a   : > { %s704_s6 = smov 128   ;;  %s705_s7 = smov 8  }
  0x2b   : > { %475 = dma.hbm_to_vmem [thread:$0]  (!%p791_p11), %s949_s1, 1024, %s126_s23, [#allocation6], %s704_s6, %s704_s6, %s705_s7  }
  0x2c   : > { %p33_p1 = scmp.ge.s32.totalorder %s31_s25, 2  ;;  %s40_s16 = sadd.s32 1, %s689_s11 }
  0x2d   : > { %p47_p2 = scmp.ne.s32.totalorder %s689_s11, %s685_s10  ;;  %p48_p4 = scmp.eq.s32.totalorder %s701_s14, 0 }
  0x2e   : > { %s976_s25 = smov (%p33_p1, %s31_s25), 0  ;;  %p962_p8 = scmp.ne.s32.totalorder %s956_s18, 0 }
  0x2f   : > { %p818_p6 = por %p48_p4, %p47_p2  ;;  %s35_s24 = ssub.s32 %s697_s13, %s976_s25 }
  0x30   : > { %p824_p10 = por %p962_p8, %p47_p2  ;;  %p485_p12 = scmp.lt.s32.totalorder %s701_s14, 2 }
  0x31   : > { %p38_p11 = scmp.eq.s32.totalorder %s35_s24, 0  ;;  %s139_s23 = sand.u32 1, %s689_s11  }
  0x32   : > { %s436_s27 = sshll.u32 %s139_s23, 3  ;;  %s460_s29 = sshll.u32 %s697_s13, 7 }
  0x33   : > { %s833_s28 = scalar_select %p38_p11, %s689_s11, %s40_s16  }
  0x34   : > { %s839_s4 = scalar_lea.hbm %s948_s0, %s460_s29  ;;  %s143_s18 = scalar_lea.vmem [#allocation2], %s436_s27 }
  0x35   : > { %s152_s5 = sshll.u32 %s143_s18, 4  ;;  %p845_p13 = pnand %p485_p12, %p818_p6  ;;  %s841_s5 = int_to_ptr.vmem [resolvable:$true] %s152_s5 }
  0x36   : > { %s849_s7 = scalar_lea.sflag [#allocation3], %s139_s23  ;;  %s585_s8 = scalar_lea.hbm %s839_s4, 128 }
  0x37   : > { %p586_p0 = scmp.ne.s32.totalorder %s839_s4, %s585_s8  ;;  %p587_p3 = pneg %p845_p13 }
  0x38   : > { %s590_s22 = scalar_lea.hbm %s948_s0, 256  ;;  %p591_p9 = scmp.lt.u32.totalorder %s839_s4, %s948_s0 }
  0x39   : > { %p588_p5 = pnand %p587_p3, %p586_p0  ;;  %p592_p1 = scmp.lt.u32.totalorder %s590_s22, %s585_s8 }
  0x3a   : > { %p594_p4 = scmp.lt.u32.totalorder %s585_s8, %s839_s4 }
  0x3b   : > { %p589_p7 = pneg %p588_p5  ;;  %p593_p2 = por %p592_p1, %p591_p9 }
  0x3d   : > { %p595_p6 = por %p594_p4, %p593_p2 }
  0x3f   : > { %p596_p8 = pnand %p595_p6, %p589_p7 }
  0x41   : > { %599 = shalt.err (!%p596_p8)
}
  0x42   : > { %s600_s23 = scalar_lea.vmem %s841_s5, 128  ;;  %s706_s29 = smov [#allocation2]  }
  0x43   : > { %p601_p12 = scmp.ne.s32.totalorder %s841_s5, %s600_s23  ;;  %s605_s30 = sshll.u32 %s706_s29, 4  ;;  %s606_s30 = int_to_ptr.vmem [resolvable:$false] %s605_s30 }
  0x44   : > { %s607_s3 = scalar_lea.vmem %s606_s30, 256  ;;  %p608_p5 = scmp.lt.s32.totalorder %s841_s5, %s606_s30 }
  0x45   : > { %p603_p11 = pnand %p601_p12, %p587_p3  ;;  %p609_p9 = scmp.lt.s32.totalorder %s607_s3, %s600_s23 }
  0x47   : > { %p604_p0 = pneg %p603_p11  ;;  %p610_p1 = por %p609_p9, %p608_p5 }
  0x49   : > { %p611_p2 = pnand %p610_p1, %p604_p0 }
  0x4b   : > { %614 = shalt.err (!%p611_p2)
}
  0x4c   : > { %s707_s18 = smov 64   ;;  %s708_s8 = smov 4  }
  0x4d   : > { %479 = dma.hbm_to_vmem [thread:$0]  (!%p845_p13), %s839_s4, 128, %s841_s5, %s849_s7, %s707_s18, %s707_s18, %s708_s8  }
  0x4e   : > { %p965_p3 = scmp.ne.s32.totalorder %s959_s21, 0 }
  0x4f   : > { %s880_s15 = sand.u32 (!%p965_p3), 1, %s685_s10   ;;  %p966_p7 = scmp.ne.s32.totalorder (!%p965_p3), %s957_s19, 0 }
  0x50   : > { %164 = sbr.rel (%p965_p3) target bundleno = 340 (0x154), region = 28  ;;  %s440_s16 = sshll.u32 (!%p965_p3), %s880_s15, 3 }
  0x51   : > { %s167_s22 = scalar_lea.sflag (!%p965_p3), [#allocation3], %s880_s15  ;;  %s170_s24 = scalar_lea.vmem (!%p965_p3), [#allocation2], %s440_s16 }
  0x57   : > { %668 = dma.done.wait (%p966_p7), %s167_s22, 128  }
  0x58   : > { %670 = vsyncadd (%p966_p7), %s167_s22, 4294967168  ;;  %p967_p4 = scmp.ne.s32.totalorder %s955_s17, 0 }
  0x5a   : > { %672 = dma.done.wait (%p967_p4), [#allocation6], 1024  }
  0x5b   : > { %674 = vsyncadd (%p967_p4), [#allocation6], 4294966272  ;;  %v709_v0 = vmov 0   ;;  %v544_v1 = vld [vmem:[#allocation5 + $0x4] ss:$8 sps:$4 sm:$0xff]   ;;  %v556_v9 = vld [vmem:[%s170_s24] sm:$0xff]  }
  0x5c   : > { %289 = vmatprep.mubr.bf16.mxu0 %v709_v0  ;;  %v546_v2 = vld [vmem:[#allocation5] ss:$8 sps:$4 sm:$0xff]   ;;  %257 = vmatprep.subr.bf16.mxu0 %v544_v1  ;;  %v547_v3 = vld [vmem:[#allocation5 + $0x14] ss:$8 sps:$4 sm:$0xff]   ;;  %v549_v4 = vld [vmem:[#allocation5 + $0x10] ss:$8 sps:$4 sm:$0xff]  }
  0x5d   : > { %258 = vmatpush1.bf16.msra.mxu0 %v546_v2  ;;  %v550_v5 = vld [vmem:[#allocation5 + $0x24] ss:$8 sps:$4 sm:$0xff]   ;;  %v552_v6 = vld [vmem:[#allocation5 + $0x20] ss:$8 sps:$4 sm:$0xff]   ;;  %v553_v7 = vld [vmem:[#allocation5 + $0x34] ss:$8 sps:$4 sm:$0xff]  }
  0x5e   : > { %259 = vmatprep.subr.bf16.mxu0 %v547_v3  ;;  %v555_v8 = vld [vmem:[#allocation5 + $0x30] ss:$8 sps:$4 sm:$0xff]   ;;  %vm253_vm0 = vcmask 523264   ;;  %s442_s17 = sshll.u32 %s880_s15, 4  ;;  %vm312_vm1 = vcmask 1043456   ;;  %vm313_vm2 = vcmask 523268  }
  0x5f   : > { %s194_s19 = scalar_lea.vmem [#allocation7], %s442_s17  ;;  %s463_s4 = sshll.u32 %s693_s12, 8  ;;  %vm314_vm3 = vmor %vm313_vm2, %vm312_vm1 }
  0x60   : > { %s334_s21 = sshll.u32 %s194_s19, 4  ;;  %s899_s7 = scalar_lea.hbm %s950_s2, %s463_s4  ;;  %s894_s21 = int_to_ptr.vmem [resolvable:$true] %s334_s21 }
  0x61   : > { %260 = vmatpush1.bf16.msra.mxu0 %v549_v4  ;;  %s318_s27 = scalar_lea.sflag [#allocation4], %s880_s15  ;;  %s615_s12 = scalar_lea.vmem %s894_s21, 256 }
  0x62   : > { %261 = vmatprep.subr.bf16.mxu0 %v550_v5  ;;  %p616_p13 = scmp.ne.s32.totalorder %s894_s21, %s615_s12  ;;  %s710_s23 = smov [#allocation7]  }
  0x63   : > { %s619_s29 = sshll.u32 %s710_s23, 4  ;;  %s620_s29 = int_to_ptr.vmem [resolvable:$false] %s619_s29 }
  0x64   : > { %p617_p6 = pnand %p616_p13, %p824_p10  ;;  %s621_s30 = scalar_lea.vmem %s620_s29, 512 }
  0x65   : > { %262 = vmatpush1.bf16.msra.mxu0 %v552_v6  ;;  %p622_p12 = scmp.lt.s32.totalorder %s894_s21, %s620_s29  ;;  %p623_p11 = scmp.lt.s32.totalorder %s621_s30, %s615_s12 }
  0x66   : > { %263 = vmatprep.subr.bf16.mxu0 %v553_v7  ;;  %p618_p8 = pneg %p617_p6 }
  0x67   : > { %p624_p0 = por %p623_p11, %p622_p12 }
  0x69   : > { %264 = vmatpush1.bf16.msra.mxu0 %v555_v8  ;;  %p625_p5 = pnand %p624_p0, %p618_p8 }
  0x6c   : > { %452 = vmatmul.mubr.msk.bf16.vlgmr.msra.gmra.mrb[0].mxu0 %vm253_vm0, %v556_v9 }
 0x13f   : > { %v291_v10 = vpop.f32.mrb[0].mxu0 }
 0x140   : > { %v293_v11 = vpop.f32.mrb[1].mxu0 }
 0x141   : > { %v461_v12 = vpack.c.bf16 %v293_v11, %v291_v10  ;;  %v295_v13 = vpop.f32.mrb[2].mxu0 }
 0x142   : > { %v297_v14 = vpop.f32.mrb[3].mxu0 }
 0x143   : > { %315 = vst.msk [vmem:[%s194_s19] sm:$0xff] %vm314_vm3, %v461_v12  ;;  %v462_v15 = vpack.c.bf16 %v297_v14, %v295_v13 }
 0x145   : > { %316 = vst.msk [vmem:[%s194_s19 + $0x8] sm:$0xff] %vm314_vm3, %v462_v15 }
 0x146   : > { %628 = shalt.err (!%p625_p5)
}
 0x147   : > { %s629_s3 = scalar_lea.hbm %s899_s7, 256  ;;  %s633_s16 = scalar_lea.hbm %s950_s2, 512 }
 0x148   : > { %p630_p9 = scmp.ne.s32.totalorder %s899_s7, %s629_s3  ;;  %p634_p3 = scmp.lt.u32.totalorder %s899_s7, %s950_s2 }
 0x149   : > { %p635_p7 = scmp.lt.u32.totalorder %s633_s16, %s629_s3  ;;  %p637_p13 = scmp.lt.u32.totalorder %s629_s3, %s899_s7 }
 0x14a   : > { %p631_p1 = pnand %p630_p9, %p824_p10 }
 0x14b   : > { %p636_p4 = por %p635_p7, %p634_p3 }
 0x14c   : > { %p632_p2 = pneg %p631_p1 }
 0x14d   : > { %p638_p6 = por %p637_p13, %p636_p4 }
 0x14f   : > { %p639_p8 = pnand %p638_p6, %p632_p2 }
 0x151   : > { %642 = shalt.err (!%p639_p8)
}
 0x152   : > { %s711_s17 = smov 128   ;;  %s712_s19 = smov 8  }
 0x153   : > { %470 = dma.vmem_to_hbm [thread:$0]  (%p824_p10), %s894_s21, 256, %s899_s7, %s318_s27, %s711_s17, %s711_s17, %s712_s19  }
 0x154 PF: > { %s349_s4 = sand.u32 1, %s681_s9   ;;  %p968_p12 = scmp.ne.s32.totalorder %s958_s20, 0 }
 0x155   : > { %p969_p11 = scmp.ge.s32.totalorder %s701_s14, 2  ;;  %s350_s5 = scalar_lea.sflag [#allocation4], %s349_s4 }
 0x157   : > { %p481_p0 = pnand %p969_p11, %p968_p12 }
 0x159   : > { %676 = dma.done.wait (!%p481_p0), %s350_s5, 256  }
 0x15a   : > { %678 = vsyncadd (!%p481_p0), %s350_s5, 4294967040  ;;  %s19_s14 = sadd.s32 1, %s701_s14   ;;  %s970_s9 = smov %s685_s10 }
 0x15b   : > { %p16_p5 = scmp.ge.s32.totalorder %s19_s14, 4   ;;  %s971_s10 = smov %s689_s11 }
 0x15c   : > { %s972_s11 = smov %s833_s28  ;;  %s973_s12 = smov %s697_s13 }
 0x15d   : > { %s974_s13 = smov %s976_s25  ;;  %18 = sbr.rel (!%p16_p5) target bundleno = 7 (0x7), region = 77 }
 0x164   :  { %355 = vsyncpa [#allocation3], 1 }
 0x165   :  { %357 = vsyncpa [#allocation3 + $0x1], 1 }
 0x166   :  { %358 = vsyncpa [#allocation6], 1 }
 0x167   :  { %359 = vsyncpa [#allocation4], 1 }
 0x168   :  { %361 = vsyncpa [#allocation4 + $0x1], 1 }

</bundles_post_ra>
